<compile_context>
chip_gen: v7x
topology: tpu7x:2x2x1
jax: 0.10.0
libtpu: 0.0.40
codegen_flags: <defaults>
</compile_context>

<pallas_src>
import math

import jax
import jax.numpy as jnp
import numpy as np
from jax.experimental import pallas as pl
from jax.experimental.pallas import tpu as pltpu

# ----------------------------- model dims (small, synthetic) -----------------------------
BATCH = 2
SEQ = 8
HIDDEN = 32
N_HEADS = 4
HEAD_DIM = HIDDEN // N_HEADS
FFN = 64
N_CLASSES = 5
VOCAB = 64
LN_EPS = 1e-12
OUT_PAD = 128                 # lane-dense logits padding
BS = BATCH * SEQ              # 16 flattened tokens
STACK = N_HEADS * BS          # 64 head-stacked rows


# ----------------------------- Pallas kernel -----------------------------
def canine_fused_kernel(x_ref, bias_ref, hmask_ref, sel_ref,
                        w32_ref, w1_ref, wcls_ref, vec_ref, out_ref):
    """Fused encoder layer + CANINE pooler + classifier head, whole problem in VMEM.

    x_ref     : [BS, H]        embeddings, flattened 2-D
    bias_ref  : [NH*BS, BS]    additive attention bias (block-diag + pad mask), pre-tiled
    hmask_ref : [NH*BS, H]     static per-head column mask (1 in head-h columns)
    sel_ref   : [BS, NH*BS]    static 0/1 head-merge selection matrix
    w32_ref   : [7H, H]        packed rows [wq*scale ; wk ; wv ; wo ; w2 ; wp]
    w1_ref    : [H, F]         FFN up-projection
    wcls_ref  : [H, 128]       classifier weight, lane-padded
    vec_ref   : [16, 128]      packed biases / LayerNorm params (one per row)
    out_ref   : [BS, 128]      lane-dense logits (first N_CLASSES lanes valid)
    """
    f32 = jnp.float32
    x = x_ref[...]
    bias = bias_ref[...]
    hmask = hmask_ref[...]
    sel = sel_ref[...]
    w32 = w32_ref[...]
    w1 = w1_ref[...]
    wcls = wcls_ref[...]
    vecs = vec_ref[...]

    # row (sublane) slices of the packed weight buffer -> whole-vreg views
    wq = w32[0 * HIDDEN:1 * HIDDEN, :]          # attention scale folded in
    wk = w32[1 * HIDDEN:2 * HIDDEN, :]
    wv = w32[2 * HIDDEN:3 * HIDDEN, :]
    wo = w32[3 * HIDDEN:4 * HIDDEN, :]
    w2 = w32[4 * HIDDEN:4 * HIDDEN + FFN, :]
    wp = w32[4 * HIDDEN + FFN:5 * HIDDEN + FFN, :]

    bq = vecs[0:1, :HIDDEN]
    bk = vecs[1:2, :HIDDEN]
    bv = vecs[2:3, :HIDDEN]
    bo = vecs[3:4, :HIDDEN]
    b1 = vecs[4:5, :FFN]
    b2 = vecs[5:6, :HIDDEN]
    bp = vecs[6:7, :HIDDEN]
    bcls = vecs[7:8, :]                          # [1, 128]
    g1 = vecs[8:9, :HIDDEN]
    be1 = vecs[9:10, :HIDDEN]
    g2 = vecs[10:11, :HIDDEN]
    be2 = vecs[11:12, :HIDDEN]

    # Q / K / V projections (full-width MXU ops, canonical lanes 0..H-1)
    q = jnp.dot(x, wq, preferred_element_type=f32) + bq     # 1/sqrt(dh) folded into wq/bq
    k = jnp.dot(x, wk, preferred_element_type=f32) + bk
    v = jnp.dot(x, wv, preferred_element_type=f32) + bv

    # Heads stacked along the sublane axis: rows [h*BS:(h+1)*BS] hold head h
    # (tile of q is whole-vreg sublane copies; head columns isolated by static mask).
    q_stack = jnp.concatenate([q, q, q, q], axis=0) * hmask  # [NH*BS, H]

    # All head scores with ONE matmul (single shared implicit K transpose).
    s = jax.lax.dot_general(
        q_stack, k, dimension_numbers=(((1,), (1,)), ((), ())),
        preferred_element_type=f32) + bias                   # [NH*BS, BS]

    # ONE softmax over the stacked tile (one max / exp / reciprocal for all heads).
    s = s - jnp.max(s, axis=-1, keepdims=True)
    p = jnp.exp(s)
    p = p * pl.reciprocal(jnp.sum(p, axis=-1, keepdims=True), approx=True)

    # All head contexts with ONE matmul; per-head columns selected by the static
    # mask, heads merged back with a static 0/1 selection matmul (idle MXU).
    ctx_blocks = jnp.dot(p, v, preferred_element_type=f32) * hmask     # [NH*BS, H]
    ctx = jnp.dot(sel, ctx_blocks, preferred_element_type=f32)         # [BS, H]

    attn_out = jnp.dot(ctx, wo, preferred_element_type=f32) + bo

    def layernorm(vv, g, b):
        mu = jnp.mean(vv, axis=-1, keepdims=True)
        var = jnp.mean((vv - mu) ** 2, axis=-1, keepdims=True)
        return (vv - mu) * jax.lax.rsqrt(var + LN_EPS) * g + b

    h1 = layernorm(x + attn_out, g1, be1)

    # feed-forward
    f = jnp.dot(h1, w1, preferred_element_type=f32) + b1
    f = jax.nn.gelu(f)
    f = jnp.dot(f, w2, preferred_element_type=f32) + b2
    h2 = layernorm(h1 + f, g2, be2)

    # CANINE pooler: tanh(dense(.)) + classifier on ALL rows (cheaper than a
    # strided CLS sublane gather); the wrapper slices the CLS rows / classes.
    # nn.Dropout is identity at inference.
    pooled = jnp.tanh(jnp.dot(h2, wp, preferred_element_type=f32) + bp)
    out_ref[...] = jnp.dot(pooled, wcls, preferred_element_type=f32) + bcls


# ----------------------------- one-time parameter packing (NOT in per-call path) -----------------------------
def pack_params(p):
    """Pack weights/biases + static masks once; returns ready device arrays."""
    scale = 1.0 / math.sqrt(HEAD_DIM)

    def to2d(w):   # [NH, H, HD] -> [H, NH*HD] (head-major columns)
        return np.transpose(np.asarray(w), (1, 0, 2)).reshape(HIDDEN, HIDDEN)

    wq = to2d(p['wq']) * scale            # fold attention scale into Q weights
    wk = to2d(p['wk'])
    wv = to2d(p['wv'])
    wo = np.asarray(p['wo']).reshape(HIDDEN, HIDDEN)        # [NH*HD, H]
    w32 = np.concatenate(
        [wq, wk, wv, wo, np.asarray(p['w2']), np.asarray(p['wp'])], axis=0
    ).astype(np.float32)                                     # [7H, H]

    wcls = np.zeros((HIDDEN, OUT_PAD), np.float32)
    wcls[:, :N_CLASSES] = np.asarray(p['wout'])

    vecs = np.zeros((16, 128), np.float32)
    vecs[0, :HIDDEN] = np.asarray(p['bq']).reshape(-1) * scale   # Q bias pre-scaled too
    vecs[1, :HIDDEN] = np.asarray(p['bk']).reshape(-1)
    vecs[2, :HIDDEN] = np.asarray(p['bv']).reshape(-1)
    vecs[3, :HIDDEN] = np.asarray(p['bo']).reshape(-1)
    vecs[4, :FFN] = np.asarray(p['b1']).reshape(-1)
    vecs[5, :HIDDEN] = np.asarray(p['b2']).reshape(-1)
    vecs[6, :HIDDEN] = np.asarray(p['bp']).reshape(-1)
    vecs[7, :N_CLASSES] = np.asarray(p['bout']).reshape(-1)
    vecs[8, :HIDDEN] = np.asarray(p['ln1_g']).reshape(-1)
    vecs[9, :HIDDEN] = np.asarray(p['ln1_b']).reshape(-1)
    vecs[10, :HIDDEN] = np.asarray(p['ln2_g']).reshape(-1)
    vecs[11, :HIDDEN] = np.asarray(p['ln2_b']).reshape(-1)

    # static per-head column mask and head-merge selection matrix
    hmask = np.zeros((STACK, HIDDEN), np.float32)
    sel = np.zeros((BS, STACK), np.float32)
    for h in range(N_HEADS):
        hmask[h * BS:(h + 1) * BS, h * HEAD_DIM:(h + 1) * HEAD_DIM] = 1.0
        sel[np.arange(BS), h * BS + np.arange(BS)] = 1.0

    return {
        'emb': jnp.asarray(p['emb'], jnp.float32),
        'pos': jnp.asarray(p['pos'], jnp.float32),
        'w32': jnp.asarray(w32),
        'w1': jnp.asarray(p['w1'], jnp.float32),
        'wcls': jnp.asarray(wcls),
        'vecs': jnp.asarray(vecs),
        'head_mask': jnp.asarray(hmask),
        'sel': jnp.asarray(sel),
    }


# ----------------------------- wrapper -----------------------------
_VMEM = pl.BlockSpec(memory_space=pltpu.MemorySpace.VMEM)


@jax.jit
def canine_occupation_classifier(input_ids, attention_mask, packed):
    B, S = input_ids.shape
    # Glue: embedding gather + position embeddings (input-dependent, stays in JAX).
    x = packed['emb'][input_ids] + packed['pos'][None, :S, :]
    x2d = x.reshape(B * S, HIDDEN).astype(jnp.float32)

    # Additive attention bias: block-diagonal (per example) + padding-key mask,
    # pre-tiled over heads. Tiny (16 KB) per-call XLA glue; static parts precomputable.
    mask = attention_mask.astype(jnp.float32).reshape(B * S)
    ex = jnp.arange(B * S, dtype=jnp.int32) // S
    keep = jnp.logical_and(ex[:, None] == ex[None, :], mask[None, :] > 0.5)
    bias16 = jnp.where(keep, 0.0, -1e9).astype(jnp.float32)        # [BS, BS]
    bias_stack = jnp.tile(bias16, (N_HEADS, 1))                    # [NH*BS, BS]

    out = pl.pallas_call(
        canine_fused_kernel,
        out_shape=jax.ShapeDtypeStruct((B * S, OUT_PAD), jnp.float32),
        in_specs=[_VMEM] * 8,
        out_specs=_VMEM,
    )(x2d, bias_stack, packed['head_mask'], packed['sel'],
      packed['w32'], packed['w1'], packed['wcls'], packed['vecs'])

    # CLS row of each example, valid class lanes only.
    return out.reshape(B, S, OUT_PAD)[:, 0, :N_CLASSES]


# ----------------------------- pure-JAX reference -----------------------------
def reference_forward(input_ids, attention_mask, p):
    x = p['emb'][input_ids] + p['pos'][None, :input_ids.shape[1], :]
    mask = attention_mask.astype(jnp.float32)
    bias = (1.0 - mask)[:, None, :] * (-1e9)
    scale = 1.0 / math.sqrt(HEAD_DIM)
    attn = jnp.zeros_like(x)
    for h in range(N_HEADS):
        qh = jnp.einsum('bsh,hd->bsd', x, p['wq'][h]) + p['bq'][h][None]
        kh = jnp.einsum('bsh,hd->bsd', x, p['wk'][h]) + p['bk'][h][None]
        vh = jnp.einsum('bsh,hd->bsd', x, p['wv'][h]) + p['bv'][h][None]
        s = jnp.einsum('bqd,bkd->bqk', qh, kh) * scale + bias
        pr = jax.nn.softmax(s, axis=-1)
        attn = attn + jnp.einsum('bsd,dh->bsh',
                                 jnp.einsum('bqk,bkd->bqd', pr, vh), p['wo'][h])
    attn = attn + p['bo'][None]

    def ln(v, g, b):
        mu = v.mean(-1, keepdims=True)
        var = ((v - mu) ** 2).mean(-1, keepdims=True)
        return (v - mu) * jax.lax.rsqrt(var + LN_EPS) * g[None] + b[None]

    h1 = ln(x + attn, p['ln1_g'], p['ln1_b'])
    f = jax.nn.gelu(jnp.einsum('bsh,hf->bsf', h1, p['w1']) + p['b1'][None])
    f = jnp.einsum('bsf,fh->bsh', f, p['w2']) + p['b2'][None]
    h2 = ln(h1 + f, p['ln2_g'], p['ln2_b'])
    pooled = jnp.tanh(h2[:, 0, :] @ p['wp'] + p['bp'])
    return pooled @ p['wout'] + p['bout']


# ----------------------------- param init -----------------------------
def init_params(key):
    ks = jax.random.split(key, 16)
    n = lambda k, shape: (0.02 * jax.random.normal(k, shape)).astype(jnp.float32)
    return {
        'emb':  n(ks[0], (VOCAB, HIDDEN)),
        'pos':  n(ks[1], (SEQ, HIDDEN)),
        'wq':   n(ks[2], (N_HEADS, HIDDEN, HEAD_DIM)),
        'bq':   jnp.zeros((N_HEADS, 1, HEAD_DIM), jnp.float32),
        'wk':   n(ks[3], (N_HEADS, HIDDEN, HEAD_DIM)),
        'bk':   jnp.zeros((N_HEADS, 1, HEAD_DIM), jnp.float32),
        'wv':   n(ks[4], (N_HEADS, HIDDEN, HEAD_DIM)),
        'bv':   jnp.zeros((N_HEADS, 1, HEAD_DIM), jnp.float32),
        'wo':   n(ks[5], (N_HEADS, HEAD_DIM, HIDDEN)),
        'bo':   jnp.zeros((1, HIDDEN), jnp.float32),
        'ln1_g': jnp.ones((1, HIDDEN), jnp.float32),
        'ln1_b': jnp.zeros((1, HIDDEN), jnp.float32),
        'w1':   n(ks[6], (HIDDEN, FFN)),
        'b1':   jnp.zeros((1, FFN), jnp.float32),
        'w2':   n(ks[7], (FFN, HIDDEN)),
        'b2':   jnp.zeros((1, HIDDEN), jnp.float32),
        'ln2_g': jnp.ones((1, HIDDEN), jnp.float32),
        'ln2_b': jnp.zeros((1, HIDDEN), jnp.float32),
        'wp':   n(ks[8], (HIDDEN, HIDDEN)),
        'bp':   jnp.zeros((HIDDEN,), jnp.float32),
        'wout': n(ks[9], (HIDDEN, N_CLASSES)),
        'bout': jnp.zeros((N_CLASSES,), jnp.float32),
    }


# ----------------------------- main -----------------------------
if __name__ == "__main__":
    key = jax.random.PRNGKey(0)
    k_ids, k_params = jax.random.split(key)

    input_ids = jax.random.randint(k_ids, (BATCH, SEQ), 0, VOCAB, dtype=jnp.int32)
    attention_mask = jnp.array(
        [[1] * SEQ, [1] * (SEQ - 2) + [0, 0]], dtype=jnp.int32
    )
    params = init_params(k_params)

    # Packing runs ONCE, outside the per-call jit path.
    packed = pack_params(params)

    logits = canine_occupation_classifier(input_ids, attention_mask, packed)
    jax.block_until_ready(logits)
    assert logits.shape == (BATCH, N_CLASSES)

    ref = reference_forward(input_ids, attention_mask, params)
    # Note: pl.reciprocal(approx=True) in the softmax denominator adds ~1e-3
    # relative error; well within the 1e-2 tolerance used here.
    assert jnp.allclose(logits, ref, atol=1e-2, rtol=1e-2), (
        f"mismatch: max abs diff = {jnp.max(jnp.abs(logits - ref))}"
    )

    print("KERNEL_OK")
</pallas_src>

<mosaic_0001>
module attributes {stable_mosaic.version = 11 : i64} {
  func.func @canine_fused_kernel(%arg0: memref<16x32xf32, #tpu.memory_space<vmem>>, %arg1: memref<64x16xf32, #tpu.memory_space<vmem>>, %arg2: memref<64x32xf32, #tpu.memory_space<vmem>>, %arg3: memref<16x64xf32, #tpu.memory_space<vmem>>, %arg4: memref<224x32xf32, #tpu.memory_space<vmem>>, %arg5: memref<32x64xf32, #tpu.memory_space<vmem>>, %arg6: memref<32x128xf32, #tpu.memory_space<vmem>>, %arg7: memref<16x128xf32, #tpu.memory_space<vmem>>, %arg8: memref<16x128xf32, #tpu.memory_space<vmem>>) attributes {dimension_semantics = [], scalar_prefetch = 0 : i64, scratch_operands = 0 : i64, tpu.core_type = #tpu.core_type<tc>} {
    %c0 = arith.constant 0 : index
    %c0_0 = arith.constant 0 : index
    %0 = vector.load %arg0[%c0, %c0_0] : memref<16x32xf32, #tpu.memory_space<vmem>>, vector<16x32xf32>
    %c0_1 = arith.constant 0 : index
    %c0_2 = arith.constant 0 : index
    %1 = vector.load %arg1[%c0_1, %c0_2] : memref<64x16xf32, #tpu.memory_space<vmem>>, vector<64x16xf32>
    %c0_3 = arith.constant 0 : index
    %c0_4 = arith.constant 0 : index
    %2 = vector.load %arg2[%c0_3, %c0_4] : memref<64x32xf32, #tpu.memory_space<vmem>>, vector<64x32xf32>
    %c0_5 = arith.constant 0 : index
    %c0_6 = arith.constant 0 : index
    %3 = vector.load %arg3[%c0_5, %c0_6] : memref<16x64xf32, #tpu.memory_space<vmem>>, vector<16x64xf32>
    %c0_7 = arith.constant 0 : index
    %c0_8 = arith.constant 0 : index
    %4 = vector.load %arg4[%c0_7, %c0_8] : memref<224x32xf32, #tpu.memory_space<vmem>>, vector<224x32xf32>
    %c0_9 = arith.constant 0 : index
    %c0_10 = arith.constant 0 : index
    %5 = vector.load %arg5[%c0_9, %c0_10] : memref<32x64xf32, #tpu.memory_space<vmem>>, vector<32x64xf32>
    %c0_11 = arith.constant 0 : index
    %c0_12 = arith.constant 0 : index
    %6 = vector.load %arg6[%c0_11, %c0_12] : memref<32x128xf32, #tpu.memory_space<vmem>>, vector<32x128xf32>
    %c0_13 = arith.constant 0 : index
    %c0_14 = arith.constant 0 : index
    %7 = vector.load %arg7[%c0_13, %c0_14] : memref<16x128xf32, #tpu.memory_space<vmem>>, vector<16x128xf32>
    %8 = vector.extract_strided_slice %4 {offsets = [0, 0], sizes = [32, 32], strides = [1, 1]} : vector<224x32xf32> to vector<32x32xf32>
    %9 = vector.extract_strided_slice %4 {offsets = [32, 0], sizes = [32, 32], strides = [1, 1]} : vector<224x32xf32> to vector<32x32xf32>
    %10 = vector.extract_strided_slice %4 {offsets = [64, 0], sizes = [32, 32], strides = [1, 1]} : vector<224x32xf32> to vector<32x32xf32>
    %11 = vector.extract_strided_slice %4 {offsets = [96, 0], sizes = [32, 32], strides = [1, 1]} : vector<224x32xf32> to vector<32x32xf32>
    %12 = vector.extract_strided_slice %4 {offsets = [128, 0], sizes = [64, 32], strides = [1, 1]} : vector<224x32xf32> to vector<64x32xf32>
    %13 = vector.extract_strided_slice %4 {offsets = [192, 0], sizes = [32, 32], strides = [1, 1]} : vector<224x32xf32> to vector<32x32xf32>
    %14 = vector.extract_strided_slice %7 {offsets = [0, 0], sizes = [1, 32], strides = [1, 1]} : vector<16x128xf32> to vector<1x32xf32>
    %15 = vector.extract_strided_slice %7 {offsets = [1, 0], sizes = [1, 32], strides = [1, 1]} : vector<16x128xf32> to vector<1x32xf32>
    %16 = vector.extract_strided_slice %7 {offsets = [2, 0], sizes = [1, 32], strides = [1, 1]} : vector<16x128xf32> to vector<1x32xf32>
    %17 = vector.extract_strided_slice %7 {offsets = [3, 0], sizes = [1, 32], strides = [1, 1]} : vector<16x128xf32> to vector<1x32xf32>
    %18 = vector.extract_strided_slice %7 {offsets = [4, 0], sizes = [1, 64], strides = [1, 1]} : vector<16x128xf32> to vector<1x64xf32>
    %19 = vector.extract_strided_slice %7 {offsets = [5, 0], sizes = [1, 32], strides = [1, 1]} : vector<16x128xf32> to vector<1x32xf32>
    %20 = vector.extract_strided_slice %7 {offsets = [6, 0], sizes = [1, 32], strides = [1, 1]} : vector<16x128xf32> to vector<1x32xf32>
    %21 = vector.extract_strided_slice %7 {offsets = [7, 0], sizes = [1, 128], strides = [1, 1]} : vector<16x128xf32> to vector<1x128xf32>
    %22 = vector.extract_strided_slice %7 {offsets = [8, 0], sizes = [1, 32], strides = [1, 1]} : vector<16x128xf32> to vector<1x32xf32>
    %23 = vector.extract_strided_slice %7 {offsets = [9, 0], sizes = [1, 32], strides = [1, 1]} : vector<16x128xf32> to vector<1x32xf32>
    %24 = vector.extract_strided_slice %7 {offsets = [10, 0], sizes = [1, 32], strides = [1, 1]} : vector<16x128xf32> to vector<1x32xf32>
    %25 = vector.extract_strided_slice %7 {offsets = [11, 0], sizes = [1, 32], strides = [1, 1]} : vector<16x128xf32> to vector<1x32xf32>
    %cst = arith.constant dense<0.000000e+00> : vector<16x32xf32>
    %26 = tpu.matmul %0, %8, %cst {dimension_numbers = #tpu.dot_dimension_numbers<[1], [0], [0], [1], [0, 0, 1, 1], [], []>} : vector<16x32xf32>, vector<32x32xf32>, vector<16x32xf32> -> vector<16x32xf32>
    %27 = vector.broadcast %14 : vector<1x32xf32> to vector<16x32xf32>
    %28 = arith.addf %26, %27 : vector<16x32xf32>
    %cst_15 = arith.constant dense<0.000000e+00> : vector<16x32xf32>
    %29 = tpu.matmul %0, %9, %cst_15 {dimension_numbers = #tpu.dot_dimension_numbers<[1], [0], [0], [1], [0, 0, 1, 1], [], []>} : vector<16x32xf32>, vector<32x32xf32>, vector<16x32xf32> -> vector<16x32xf32>
    %30 = vector.broadcast %15 : vector<1x32xf32> to vector<16x32xf32>
    %31 = arith.addf %29, %30 : vector<16x32xf32>
    %cst_16 = arith.constant dense<0.000000e+00> : vector<16x32xf32>
    %32 = tpu.matmul %0, %10, %cst_16 {dimension_numbers = #tpu.dot_dimension_numbers<[1], [0], [0], [1], [0, 0, 1, 1], [], []>} : vector<16x32xf32>, vector<32x32xf32>, vector<16x32xf32> -> vector<16x32xf32>
    %33 = vector.broadcast %16 : vector<1x32xf32> to vector<16x32xf32>
    %34 = arith.addf %32, %33 : vector<16x32xf32>
    %35 = tpu.concatenate %28, %28, %28, %28 in 0 : vector<16x32xf32>, vector<16x32xf32>, vector<16x32xf32>, vector<16x32xf32> -> vector<64x32xf32>
    %36 = arith.mulf %35, %2 : vector<64x32xf32>
    %cst_17 = arith.constant dense<0.000000e+00> : vector<64x16xf32>
    %37 = tpu.matmul %36, %31, %cst_17 {dimension_numbers = #tpu.dot_dimension_numbers<[1], [1], [0], [0], [0, 0, 1, 0], [], []>} : vector<64x32xf32>, vector<16x32xf32>, vector<64x16xf32> -> vector<64x16xf32>
    %38 = arith.addf %37, %1 : vector<64x16xf32>
    %cst_18 = arith.constant dense<0xFF800000> : vector<64xf32>
    %39 = vector.multi_reduction <maximumf>, %38, %cst_18 [1] : vector<64x16xf32> to vector<64xf32>
    %40 = vector.shape_cast %39 : vector<64xf32> to vector<64x1xf32>
    %41 = vector.broadcast %40 : vector<64x1xf32> to vector<64x16xf32>
    %42 = arith.subf %38, %41 : vector<64x16xf32>
    %43 = math.exp %42 : vector<64x16xf32>
    %cst_19 = arith.constant dense<0.000000e+00> : vector<64xf32>
    %44 = vector.multi_reduction <add>, %43, %cst_19 [1] : vector<64x16xf32> to vector<64xf32>
    %45 = vector.shape_cast %44 : vector<64xf32> to vector<64x1xf32>
    %46 = tpu.reciprocal %45 {approx = true} : vector<64x1xf32> -> vector<64x1xf32>
    %47 = vector.broadcast %46 : vector<64x1xf32> to vector<64x16xf32>
    %48 = arith.mulf %43, %47 : vector<64x16xf32>
    %cst_20 = arith.constant dense<0.000000e+00> : vector<64x32xf32>
    %49 = tpu.matmul %48, %34, %cst_20 {dimension_numbers = #tpu.dot_dimension_numbers<[1], [0], [0], [1], [0, 0, 1, 1], [], []>} : vector<64x16xf32>, vector<16x32xf32>, vector<64x32xf32> -> vector<64x32xf32>
    %50 = arith.mulf %49, %2 : vector<64x32xf32>
    %cst_21 = arith.constant dense<0.000000e+00> : vector<16x32xf32>
    %51 = tpu.matmul %3, %50, %cst_21 {dimension_numbers = #tpu.dot_dimension_numbers<[1], [0], [0], [1], [0, 0, 1, 1], [], []>} : vector<16x64xf32>, vector<64x32xf32>, vector<16x32xf32> -> vector<16x32xf32>
    %cst_22 = arith.constant dense<0.000000e+00> : vector<16x32xf32>
    %52 = tpu.matmul %51, %11, %cst_22 {dimension_numbers = #tpu.dot_dimension_numbers<[1], [0], [0], [1], [0, 0, 1, 1], [], []>} : vector<16x32xf32>, vector<32x32xf32>, vector<16x32xf32> -> vector<16x32xf32>
    %53 = vector.broadcast %17 : vector<1x32xf32> to vector<16x32xf32>
    %54 = arith.addf %52, %53 : vector<16x32xf32>
    %55 = arith.addf %0, %54 : vector<16x32xf32>
    %cst_23 = arith.constant dense<0.000000e+00> : vector<16xf32>
    %56 = vector.multi_reduction <add>, %55, %cst_23 [1] : vector<16x32xf32> to vector<16xf32>
    %57 = vector.shape_cast %56 : vector<16xf32> to vector<16x1xf32>
    %cst_24 = arith.constant 3.200000e+01 : f32
    %58 = vector.broadcast %cst_24 : f32 to vector<16x1xf32>
    %59 = arith.divf %57, %58 : vector<16x1xf32>
    %60 = vector.broadcast %59 : vector<16x1xf32> to vector<16x32xf32>
    %61 = arith.subf %55, %60 : vector<16x32xf32>
    %62 = arith.mulf %61, %61 : vector<16x32xf32>
    %cst_25 = arith.constant dense<0.000000e+00> : vector<16xf32>
    %63 = vector.multi_reduction <add>, %62, %cst_25 [1] : vector<16x32xf32> to vector<16xf32>
    %64 = vector.shape_cast %63 : vector<16xf32> to vector<16x1xf32>
    %cst_26 = arith.constant 3.200000e+01 : f32
    %65 = vector.broadcast %cst_26 : f32 to vector<16x1xf32>
    %66 = arith.divf %64, %65 : vector<16x1xf32>
    %67 = vector.broadcast %59 : vector<16x1xf32> to vector<16x32xf32>
    %68 = arith.subf %55, %67 : vector<16x32xf32>
    %cst_27 = arith.constant 9.99999996E-13 : f32
    %69 = vector.broadcast %cst_27 : f32 to vector<16x1xf32>
    %70 = arith.addf %66, %69 : vector<16x1xf32>
    %71 = math.rsqrt %70 : vector<16x1xf32>
    %72 = vector.broadcast %71 : vector<16x1xf32> to vector<16x32xf32>
    %73 = arith.mulf %68, %72 : vector<16x32xf32>
    %74 = vector.broadcast %22 : vector<1x32xf32> to vector<16x32xf32>
    %75 = arith.mulf %73, %74 : vector<16x32xf32>
    %76 = vector.broadcast %23 : vector<1x32xf32> to vector<16x32xf32>
    %77 = arith.addf %75, %76 : vector<16x32xf32>
    %cst_28 = arith.constant dense<0.000000e+00> : vector<16x64xf32>
    %78 = tpu.matmul %77, %5, %cst_28 {dimension_numbers = #tpu.dot_dimension_numbers<[1], [0], [0], [1], [0, 0, 1, 1], [], []>} : vector<16x32xf32>, vector<32x64xf32>, vector<16x64xf32> -> vector<16x64xf32>
    %79 = vector.broadcast %18 : vector<1x64xf32> to vector<16x64xf32>
    %80 = arith.addf %78, %79 : vector<16x64xf32>
    %81 = arith.mulf %80, %80 : vector<16x64xf32>
    %82 = arith.mulf %80, %81 : vector<16x64xf32>
    %cst_29 = arith.constant 4.471500e-02 : f32
    %83 = vector.broadcast %cst_29 : f32 to vector<16x64xf32>
    %84 = arith.mulf %83, %82 : vector<16x64xf32>
    %85 = arith.addf %80, %84 : vector<16x64xf32>
    %cst_30 = arith.constant 0.797884583 : f32
    %86 = vector.broadcast %cst_30 : f32 to vector<16x64xf32>
    %87 = arith.mulf %86, %85 : vector<16x64xf32>
    %88 = math.tanh %87 : vector<16x64xf32>
    %cst_31 = arith.constant 1.000000e+00 : f32
    %89 = vector.broadcast %cst_31 : f32 to vector<16x64xf32>
    %90 = arith.addf %89, %88 : vector<16x64xf32>
    %cst_32 = arith.constant 5.000000e-01 : f32
    %91 = vector.broadcast %cst_32 : f32 to vector<16x64xf32>
    %92 = arith.mulf %91, %90 : vector<16x64xf32>
    %93 = arith.mulf %80, %92 : vector<16x64xf32>
    %cst_33 = arith.constant dense<0.000000e+00> : vector<16x32xf32>
    %94 = tpu.matmul %93, %12, %cst_33 {dimension_numbers = #tpu.dot_dimension_numbers<[1], [0], [0], [1], [0, 0, 1, 1], [], []>} : vector<16x64xf32>, vector<64x32xf32>, vector<16x32xf32> -> vector<16x32xf32>
    %95 = vector.broadcast %19 : vector<1x32xf32> to vector<16x32xf32>
    %96 = arith.addf %94, %95 : vector<16x32xf32>
    %97 = arith.addf %77, %96 : vector<16x32xf32>
    %cst_34 = arith.constant dense<0.000000e+00> : vector<16xf32>
    %98 = vector.multi_reduction <add>, %97, %cst_34 [1] : vector<16x32xf32> to vector<16xf32>
    %99 = vector.shape_cast %98 : vector<16xf32> to vector<16x1xf32>
    %cst_35 = arith.constant 3.200000e+01 : f32
    %100 = vector.broadcast %cst_35 : f32 to vector<16x1xf32>
    %101 = arith.divf %99, %100 : vector<16x1xf32>
    %102 = vector.broadcast %101 : vector<16x1xf32> to vector<16x32xf32>
    %103 = arith.subf %97, %102 : vector<16x32xf32>
    %104 = arith.mulf %103, %103 : vector<16x32xf32>
    %cst_36 = arith.constant dense<0.000000e+00> : vector<16xf32>
    %105 = vector.multi_reduction <add>, %104, %cst_36 [1] : vector<16x32xf32> to vector<16xf32>
    %106 = vector.shape_cast %105 : vector<16xf32> to vector<16x1xf32>
    %cst_37 = arith.constant 3.200000e+01 : f32
    %107 = vector.broadcast %cst_37 : f32 to vector<16x1xf32>
    %108 = arith.divf %106, %107 : vector<16x1xf32>
    %109 = vector.broadcast %101 : vector<16x1xf32> to vector<16x32xf32>
    %110 = arith.subf %97, %109 : vector<16x32xf32>
    %cst_38 = arith.constant 9.99999996E-13 : f32
    %111 = vector.broadcast %cst_38 : f32 to vector<16x1xf32>
    %112 = arith.addf %108, %111 : vector<16x1xf32>
    %113 = math.rsqrt %112 : vector<16x1xf32>
    %114 = vector.broadcast %113 : vector<16x1xf32> to vector<16x32xf32>
    %115 = arith.mulf %110, %114 : vector<16x32xf32>
    %116 = vector.broadcast %24 : vector<1x32xf32> to vector<16x32xf32>
    %117 = arith.mulf %115, %116 : vector<16x32xf32>
    %118 = vector.broadcast %25 : vector<1x32xf32> to vector<16x32xf32>
    %119 = arith.addf %117, %118 : vector<16x32xf32>
    %cst_39 = arith.constant dense<0.000000e+00> : vector<16x32xf32>
    %120 = tpu.matmul %119, %13, %cst_39 {dimension_numbers = #tpu.dot_dimension_numbers<[1], [0], [0], [1], [0, 0, 1, 1], [], []>} : vector<16x32xf32>, vector<32x32xf32>, vector<16x32xf32> -> vector<16x32xf32>
    %121 = vector.broadcast %20 : vector<1x32xf32> to vector<16x32xf32>
    %122 = arith.addf %120, %121 : vector<16x32xf32>
    %123 = math.tanh %122 : vector<16x32xf32>
    %cst_40 = arith.constant dense<0.000000e+00> : vector<16x128xf32>
    %124 = tpu.matmul %123, %6, %cst_40 {dimension_numbers = #tpu.dot_dimension_numbers<[1], [0], [0], [1], [0, 0, 1, 1], [], []>} : vector<16x32xf32>, vector<32x128xf32>, vector<16x128xf32> -> vector<16x128xf32>
    %125 = vector.broadcast %21 : vector<1x128xf32> to vector<16x128xf32>
    %126 = arith.addf %124, %125 : vector<16x128xf32>
    %c0_41 = arith.constant 0 : index
    %c0_42 = arith.constant 0 : index
    %127 = vector.load %arg8[%c0_41, %c0_42] : memref<16x128xf32, #tpu.memory_space<vmem>>, vector<16x128xf32>
    tpu.vector_store %arg8[%c0_41, %c0_42], %126 {strides = array<i32>} : memref<16x128xf32, #tpu.memory_space<vmem>>, vector<16x128xf32>,
    return
  }
}

</mosaic_0001>

<bundles_post_ra>
// kernel: canine_occupation_classifier.1
= control target key start
LH: loop header
LB: loop body
LE: loop exit
PB: predicated region body
PF: predicated region fallthrough
CT: control target
= control target key end

     0   :  { %vm91_vm0 = vcmask 261120   ;;  %v87_v14 = vlaneseq  ;;  %vm474_vm2 = vcmask 130048   ;;  %vm700_vm3 = vcmask 523264   ;;  %s2096_s4 = inlined_call_operand.vmem [shape: f32[224,32], index: 4, kind: input, shape index: {}]   ;;  %s2097_s0 = inlined_call_operand.vmem [shape: f32[16,32], index: 0, kind: input, shape index: {}]   ;;  %s2098_s7 = inlined_call_operand.vmem [shape: f32[16,128], index: 7, kind: input, shape index: {}]   ;;  %s2099_s2 = inlined_call_operand.vmem [shape: f32[64,32], index: 2, kind: input, shape index: {}]   ;;  %s2100_s1 = inlined_call_operand.vmem [shape: f32[64,16], index: 1, kind: input, shape index: {}]   ;;  %s2101_s3 = inlined_call_operand.vmem [shape: f32[16,64], index: 3, kind: input, shape index: {}]   ;;  %s2102_s5 = inlined_call_operand.vmem [shape: f32[32,64], index: 5, kind: input, shape index: {}]   ;;  %s2103_s6 = inlined_call_operand.vmem [shape: f32[32,128], index: 6, kind: input, shape index: {}]   ;;  %s2104_s8 = inlined_call_operand.vmem [shape: f32[16,128], index: 8, kind: output, shape index: {}]  }
   0x1   :  { %v53_v0 = vld [vmem:[%s2096_s4 + $0x20] sm:$0xff]  ;;  %v54_v1 = vld [vmem:[%s2096_s4 + $0x28] sm:$0xff]  ;;  %v55_v2 = vld [vmem:[%s2096_s4 + $0x30] sm:$0xff] }
   0x2   :  { %v1587_v3 = vpack.c.bf16 %v54_v1, %v53_v0  ;;  %v56_v4 = vld [vmem:[%s2096_s4 + $0x38] sm:$0xff]  ;;  %v49_v5 = vld [vmem:[%s2096_s4] sm:$0xff]  ;;  %v50_v6 = vld [vmem:[%s2096_s4 + $0x8] sm:$0xff]  ;;  %v1814_v15 = vshrl.u32 %v87_v14, 7 }
   0x3   :  { %v1591_v7 = vpack.c.bf16 %v56_v4, %v55_v2  ;;  %v1579_v8 = vpack.c.bf16 %v50_v6, %v49_v5  ;;  %v1791_v9 = vld [vmem:[%s2097_s0] sm:$0xff]  ;;  %v51_v10 = vld [vmem:[%s2096_s4 + $0x10] sm:$0xff]  ;;  %v52_v11 = vld [vmem:[%s2096_s4 + $0x18] sm:$0xff] }
   0x4   :  { %1588 = vmatprep.subr.bf16.mxu1 %v1587_v3  ;;  %1451 = vmatprep.mubr.msk.f32.mxu1 %vm91_vm0, %v1791_v9  ;;  %v1583_v12 = vpack.c.bf16 %v52_v11, %v51_v10  ;;  %v1806_v13 = vld [vmem:[%s2097_s0 + $0x8] sm:$0xff]  ;;  %v175_v16 = vsub.s32 1, %v1814_v15  ;;  %v1820_v17 = vld [vmem:[%s2098_s7] sm:$0xff]  ;;  %v89_v18 = vsub.s32 0, %v1814_v15  ;;  %vm1604_vm1 = vmpackc.low %vm91_vm0, %vm91_vm0 }
   0x5   :  { %1590 = vmatpush3.bf16.msra.mxu1 %v1587_v3  ;;  %1580 = vmatprep.subr.bf16.mxu0 %v1579_v8  ;;  %v1832_v27 = vld [vmem:[%s2099_s2] sm:$0xff]  ;;  %v1841_v32 = vld [vmem:[%s2099_s2 + $0x8] sm:$0xff]  ;;  %v1846_v33 = vld [vmem:[%s2099_s2 + $0x10] sm:$0xff] }
   0x6   :  { %1592 = vmatprep.subr.bf16.mxu1 %v1591_v7  ;;  %1582 = vmatpush3.bf16.msra.mxu0 %v1579_v8  ;;  %v176_v19 = vrot.slane %v1820_v17, %v175_v16  ;;  %v90_v20 = vrot.slane %v1820_v17, %v89_v18  ;;  %v1853_v36 = vld [vmem:[%s2099_s2 + $0x18] sm:$0xff]  ;;  %v1859_v37 = vld [vmem:[%s2099_s2 + $0x20] sm:$0xff]  ;;  %v1867_v40 = vld [vmem:[%s2099_s2 + $0x28] sm:$0xff] }
   0x7   :  { %1584 = vmatprep.subr.bf16.mxu0 %v1583_v12  ;;  %1440 = vmatprep.mubr.msk.f32.mxu0 %vm91_vm0, %v1791_v9  ;;  %v1873_v41 = vld [vmem:[%s2099_s2 + $0x30] sm:$0xff]  ;;  %v1881_v44 = vld [vmem:[%s2099_s2 + $0x38] sm:$0xff]  ;;  %v57_v46 = vld [vmem:[%s2096_s4 + $0x40] sm:$0xff] }
   0x8   :  { %v58_v47 = vld [vmem:[%s2096_s4 + $0x48] sm:$0xff]  ;;  %v59_v48 = vld [vmem:[%s2096_s4 + $0x50] sm:$0xff]  ;;  %v60_v50 = vld [vmem:[%s2096_s4 + $0x58] sm:$0xff] }
   0x9   :  { %1594 = vmatpush3.bf16.msra.mxu1 %v1591_v7  ;;  %v1595_v49 = vpack.c.bf16 %v58_v47, %v57_v46  ;;  %v1599_v51 = vpack.c.bf16 %v60_v50, %v59_v48  ;;  %v31_v52 = vld [vmem:[%s2100_s1] sm:$0xff]  ;;  %v32_v54 = vld [vmem:[%s2100_s1 + $0x8] sm:$0xff]  ;;  %v33_v57 = vld [vmem:[%s2100_s1 + $0x10] sm:$0xff] }
   0xa   :  { %1586 = vmatpush3.bf16.msra.mxu0 %v1583_v12  ;;  %v34_v61 = vld [vmem:[%s2100_s1 + $0x18] sm:$0xff]  ;;  %v35_v0 = vld [vmem:[%s2100_s1 + $0x20] sm:$0xff]  ;;  %v36_v5 = vld [vmem:[%s2100_s1 + $0x28] sm:$0xff] }
   0xb   :  { %1596 = vmatprep.subr.bf16.mxu0 %v1595_v49  ;;  %v37_v8 = vld [vmem:[%s2100_s1 + $0x30] sm:$0xff] }
   0xc   :  { %1452 = vmatmul.mubr.msk.f32.vlgmr.msra.gmra.mrb[0].mxu1 %vm91_vm0, %v1806_v13 }
   0xd   :  { %1441 = vmatmul.mubr.msk.f32.vlgmr.msra.gmra.mrb[0].mxu0 %vm91_vm0, %v1806_v13 }
   0xe   :  { %1462 = vmatprep.mubr.msk.f32.mxu0 %vm91_vm0, %v1791_v9  ;;  %1598 = vmatpush3.bf16.msra.mxu0 %v1595_v49 }
   0xf   :  { %1600 = vmatprep.subr.bf16.mxu0 %v1599_v51 }
  0x12   :  { %1602 = vmatpush3.bf16.msra.mxu0 %v1599_v51 }
  0x15   :  { %1463 = vmatmul.mubr.msk.f32.vlgmr.msra.gmra.mrb[2].mxu0 %vm91_vm0, %v1806_v13 }
  0xdf   :  { %v1453_v21 = vpop.f32.mrb[0].mxu1 }
  0xe0   :  { %v249_v22 = vadd.f32 %v1453_v21, %v176_v19  ;;  %v243_v23 = vpop.f32.mrb[1].mxu1  ;;  %v1442_v24 = vpop.f32.mrb[0].mxu0 }
  0xe1   :  { %v244_v25 = vadd.f32 %v243_v23, %v176_v19  ;;  %v164_v26 = vpop.f32.mrb[1].mxu0  ;;  %v170_v31 = vadd.f32 %v1442_v24, %v90_v20  ;;  %v38_v19 = vld [vmem:[%s2100_s1 + $0x38] sm:$0xff] }
  0xe2   :  { %v165_v28 = vadd.f32 %v164_v26, %v90_v20 }
  0xe3   :  { %v1603_v29 = vpack.c.bf16 %v249_v22, %v244_v25  ;;  %v332_v34 = vmul.f32 %v170_v31, %v1841_v32  ;;  %v334_v38 = vmul.f32 %v170_v31, %v1853_v36  ;;  %v336_v42 = vmul.f32 %v170_v31, %v1867_v40 }
  0xe4   :  { %v331_v30 = vmul.f32 %v165_v28, %v1832_v27  ;;  %v333_v35 = vmul.f32 %v165_v28, %v1846_v33  ;;  %v335_v39 = vmul.f32 %v165_v28, %v1859_v37  ;;  %v337_v43 = vmul.f32 %v165_v28, %v1873_v41 }
  0xe5   :  { %1605 = vmatprep.subr.msk.bf16.mxu1 %vm1604_vm1, %v1603_v29  ;;  %v338_v45 = vmul.f32 %v170_v31, %v1881_v44 }
  0xe6   :  { %1608 = vmatpush3.bf16.xpose.msk.msra.mxu1 %vm1604_vm1, %v1603_v29  ;;  %1469 = vmatprep.mubr.msk.f32.mxu1 %vm91_vm0, %v331_v30 }
  0xed   :  { %1470 = vmatmul.mubr.msk.f32.vlgmr.msra.gmra.mrb[2].mxu1 %vm91_vm0, %v332_v34 }
  0xee   :  { %1472 = vmatprep.mubr.msk.f32.mxu1 %vm91_vm0, %v333_v35 }
  0xf1   :  { %1473 = vmatmul.mubr.msk.f32.gmra.mrb[4].mxu1 %vm91_vm0, %v334_v38 }
  0xf2   :  { %1475 = vmatprep.mubr.msk.f32.mxu1 %vm91_vm0, %v335_v39 }
  0xf5   :  { %1476 = vmatmul.mubr.msk.f32.gmra.mrb[6].mxu1 %vm91_vm0, %v336_v42 }
  0xf6   :  { %1478 = vmatprep.mubr.msk.f32.mxu1 %vm91_vm0, %v337_v43 }
  0xf9   :  { %1479 = vmatmul.mubr.msk.f32.gmra.mrb[8].mxu1 %vm91_vm0, %v338_v45 }
 0x1c0   :  { %v1471_v53 = vpop.f32.mrb[2].mxu1 }
 0x1c1   :  { %v435_v55 = vpop.f32.mrb[3].mxu1  ;;  %v441_v58 = vadd.f32 %v1471_v53, %v32_v54 }
 0x1c2   :  { %v436_v56 = vadd.f32 %v435_v55, %v31_v52 }
 0x1c3   :  { %v478_v4 = vsel %vm474_vm2, %v441_v58, -inf }
 0x1c4   :  { %v1474_v59 = vpop.f32.mrb[4].mxu1  ;;  %v475_v60 = vsel %vm474_vm2, %v436_v56, -inf }
 0x1c5   :  { %v445_v62 = vpop.f32.mrb[5].mxu1  ;;  %476 = vmax.xlane.f32.xlu0 %v475_v60  ;;  %v451_v1 = vadd.f32 %v1474_v59, %v34_v61 }
 0x1c6   :  { %v446_v63 = vadd.f32 %v445_v62, %v33_v57 }
 0x1c7   :  { %v484_v12 = vsel %vm474_vm2, %v451_v1, -inf }
 0x1c8   :  { %v1477_v2 = vpop.f32.mrb[6].mxu1  ;;  %v481_v3 = vsel %vm474_vm2, %v446_v63, -inf }
 0x1c9   :  { %v455_v6 = vpop.f32.mrb[7].mxu1  ;;  %482 = vmax.xlane.f32.xlu1 %v481_v3  ;;  %479 = vmax.xlane.f32.xlu0 %v478_v4  ;;  %v461_v10 = vadd.f32 %v1477_v2, %v36_v5 }
 0x1ca   :  { %v456_v7 = vadd.f32 %v455_v6, %v35_v0 }
 0x1cb   :  { %v490_v23 = vsel %vm474_vm2, %v461_v10, -inf }
 0x1cc   :  { %v1480_v11 = vpop.f32.mrb[8].mxu1  ;;  %v487_v14 = vsel %vm474_vm2, %v456_v7, -inf }
 0x1cd   :  { %v465_v20 = vpop.f32.mrb[9].mxu1  ;;  %485 = vmax.xlane.f32.xlu1 %v484_v12  ;;  %488 = vmax.xlane.f32.xlu0 %v487_v14  ;;  %v471_v22 = vadd.f32 %v1480_v11, %v38_v19  ;;  %v254_v11 = vsub.s32 2, %v1814_v15  ;;  %v1464_v14 = vpop.f32.mrb[2].mxu0 }
 0x1ce   :  { %v466_v21 = vadd.f32 %v465_v20, %v37_v8  ;;  %v322_v19 = vpop.f32.mrb[3].mxu0 }
 0x1cf   :  { %v496_v25 = vsel %vm474_vm2, %v471_v22, -inf  ;;  %v255_v12 = vrot.slane %v1820_v17, %v254_v11 }
 0x1d0   :  { %v493_v24 = vsel %vm474_vm2, %v466_v21, -inf }
 0x1d1   :  { %491 = vmax.xlane.f32.xlu1 %v490_v23  ;;  %494 = vmax.xlane.f32.xlu0 %v493_v24  ;;  %v328_v20 = vadd.f32 %v1464_v14, %v255_v12 }
 0x1d5   :  { %497 = vmax.xlane.f32.xlu1 %v496_v25 }
 0x252   :  { %v477_v26 = vpop.xlane.xlu0 %476 }
 0x253   :  { %v499_v28 = vsub.f32 %v436_v56, %v477_v26 }
 0x255   :  { %v507_v29 = vmul.f32 1.442695, %v499_v28 }
 0x256   :  { %v483_v30 = vpop.xlane.xlu1 %482  ;;  %v480_v31 = vpop.xlane.xlu0 %479 }
 0x257   :  { %1677 = vpow2.f32 %v507_v29  ;;  %v501_v34 = vsub.f32 %v446_v63, %v483_v30  ;;  %v500_v35 = vsub.f32 %v441_v58, %v480_v31 }
 0x259   :  { %v511_v38 = vmul.f32 1.442695, %v501_v34  ;;  %v509_v39 = vmul.f32 1.442695, %v500_v35 }
 0x25a   :  { %v486_v42 = vpop.xlane.xlu1 %485  ;;  %v489_v43 = vpop.xlane.xlu0 %488 }
 0x25b   :  { %1679 = vpow2.f32 %v511_v38  ;;  %v502_v45 = vsub.f32 %v451_v1, %v486_v42  ;;  %v503_v46 = vsub.f32 %v456_v7, %v489_v43 }
 0x25c   :  { %1681 = vpow2.f32 %v509_v39 }
 0x25d   :  { %v513_v47 = vmul.f32 1.442695, %v502_v45  ;;  %v515_v48 = vmul.f32 1.442695, %v503_v46 }
 0x25e   :  { %v492_v49 = vpop.xlane.xlu1 %491  ;;  %v495_v50 = vpop.xlane.xlu0 %494 }
 0x25f   :  { %1683 = vpow2.f32 %v513_v47  ;;  %v504_v51 = vsub.f32 %v461_v10, %v492_v49  ;;  %v505_v52 = vsub.f32 %v466_v21, %v495_v50  ;;  %v323_v21 = vadd.f32 %v322_v19, %v255_v12 }
 0x260   :  { %1685 = vpow2.f32 %v515_v48 }
 0x261   :  { %v1678_v53 = vpop.eup %1677  ;;  %v517_v54 = vmul.f32 1.442695, %v504_v51  ;;  %v519_v55 = vmul.f32 1.442695, %v505_v52 }
 0x262   :  { %v498_v56 = vpop.xlane.xlu1 %497  ;;  %v523_v57 = vsel %vm474_vm2, %v1678_v53, 0.0 }
 0x263   :  { %1687 = vpow2.f32 %v517_v54  ;;  %v506_v58 = vsub.f32 %v471_v22, %v498_v56  ;;  %524 = vadd.xlane.f32.xlu0 %v523_v57  ;;  %v1609_v22 = vpack.c.bf16 %v328_v20, %v323_v21  ;;  %v61_v56 = vld [vmem:[%s2096_s4 + $0x60] sm:$0xff]  ;;  %v62_v57 = vld [vmem:[%s2096_s4 + $0x68] sm:$0xff] }
 0x264   :  { %1689 = vpow2.f32 %v519_v55  ;;  %v47_v55 = vld [vmem:[%s2101_s3] sm:$0xff] }
 0x265   :  { %v1680_v59 = vpop.eup %1679  ;;  %v521_v60 = vmul.f32 1.442695, %v506_v58  ;;  %1610 = vmatprep.subr.bf16.mxu0 %v1609_v22  ;;  %1513 = vmatprep.mubr.msk.f32.mxu1 %vm700_vm3, %v47_v55  ;;  %v63_v58 = vld [vmem:[%s2096_s4 + $0x70] sm:$0xff] }
 0x266   :  { %v1682_v61 = vpop.eup %1681  ;;  %v529_v62 = vsel %vm474_vm2, %v1680_v59, 0.0  ;;  %1612 = vmatpush3.bf16.msra.mxu0 %v1609_v22 }
 0x267   :  { %1691 = vpow2.f32 %v521_v60  ;;  %530 = vadd.xlane.f32.xlu0 %v529_v62  ;;  %v526_v63 = vsel %vm474_vm2, %v1682_v61, 0.0  ;;  %v64_v60 = vld [vmem:[%s2096_s4 + $0x78] sm:$0xff] }
 0x268   :  { %527 = vadd.xlane.f32.xlu1 %v526_v63 }
 0x269   :  { %v1684_v0 = vpop.eup %1683 }
 0x26a   :  { %v1686_v1 = vpop.eup %1685  ;;  %v532_v2 = vsel %vm474_vm2, %v1684_v0, 0.0 }
 0x26b   :  { %v535_v3 = vsel %vm474_vm2, %v1686_v1, 0.0 }
 0x26c   :  { %533 = vadd.xlane.f32.xlu1 %v532_v2  ;;  %536 = vadd.xlane.f32.xlu0 %v535_v3 }
 0x26d   :  { %v1688_v4 = vpop.eup %1687 }
 0x26e   :  { %v1690_v5 = vpop.eup %1689  ;;  %v538_v6 = vsel %vm474_vm2, %v1688_v4, 0.0 }
 0x26f   :  { %v541_v7 = vsel %vm474_vm2, %v1690_v5, 0.0 }
 0x270   :  { %539 = vadd.xlane.f32.xlu1 %v538_v6  ;;  %542 = vadd.xlane.f32.xlu0 %v541_v7 }
 0x271   :  { %v1692_v8 = vpop.eup %1691 }
 0x272   :  { %v544_v10 = vsel %vm474_vm2, %v1692_v8, 0.0 }
 0x274   :  { %545 = vadd.xlane.f32.xlu1 %v544_v10 }
 0x2f0   :  { %v525_v23 = vpop.xlane.xlu0 %524 }
 0x2f1   :  { %1693 = vrcp.f32 %v525_v23 }
 0x2f4   :  { %v531_v24 = vpop.xlane.xlu0 %530 }
 0x2f5   :  { %v528_v25 = vpop.xlane.xlu1 %527  ;;  %1695 = vrcp.f32 %v531_v24 }
 0x2f6   :  { %1697 = vrcp.f32 %v528_v25 }
 0x2f9   :  { %v534_v26 = vpop.xlane.xlu1 %533  ;;  %v537_v28 = vpop.xlane.xlu0 %536 }
 0x2fa   :  { %1699 = vrcp.f32 %v534_v26 }
 0x2fb   :  { %v1694_v29 = vpop.eup %1693  ;;  %1701 = vrcp.f32 %v537_v28 }
 0x2fc   :  { %v555_v30 = vmul.f32 %v1694_v29, %v1678_v53 }
 0x2fd   :  { %v540_v31 = vpop.xlane.xlu1 %539  ;;  %v543_v34 = vpop.xlane.xlu0 %542 }
 0x2fe   :  { %1703 = vrcp.f32 %v540_v31  ;;  %1485 = vmatprep.mubr.msk.f32.mxu0 %vm474_vm2, %v555_v30 }
 0x2ff   :  { %v1696_v35 = vpop.eup %1695  ;;  %1705 = vrcp.f32 %v543_v34 }
 0x300   :  { %v1698_v38 = vpop.eup %1697  ;;  %v557_v39 = vmul.f32 %v1696_v35, %v1680_v59  ;;  %v1629_v59 = vpack.c.bf16 %v62_v57, %v61_v56 }
 0x301   :  { %v556_v42 = vmul.f32 %v1698_v38, %v1682_v61  ;;  %v546_v43 = vpop.xlane.xlu1 %545  ;;  %v1633_v61 = vpack.c.bf16 %v64_v60, %v63_v58  ;;  %v2008_v58 = vld [vmem:[%s2098_s7 + $0x8] sm:$0xff] }
 0x302   :  { %1707 = vrcp.f32 %v546_v43  ;;  %1630 = vmatprep.subr.bf16.mxu0 %v1629_v59 }
 0x303   :  { %1486 = vmatmul.mubr.msk.f32.vlgmr.msra.gmra.mrb[4].mxu0 %vm474_vm2, %v556_v42 }
 0x304   :  { %v1700_v45 = vpop.eup %1699  ;;  %1488 = vmatprep.mubr.msk.f32.mxu0 %vm474_vm2, %v557_v39  ;;  %1632 = vmatpush3.bf16.msra.mxu0 %v1629_v59  ;;  %v899_v59 = vrot.slane %v2008_v58, %v89_v18  ;;  %v65_v18 = vld [vmem:[%s2096_s4 + $0x80] sm:$0xff] }
 0x305   :  { %v1702_v46 = vpop.eup %1701  ;;  %v558_v47 = vmul.f32 %v1700_v45, %v1684_v0  ;;  %1634 = vmatprep.subr.bf16.mxu0 %v1633_v61 }
 0x306   :  { %v559_v48 = vmul.f32 %v1702_v46, %v1686_v1 }
 0x307   :  { %1489 = vmatmul.mubr.msk.f32.gmra.mrb[6].mxu0 %vm474_vm2, %v558_v47  ;;  %v78_v47 = vld [vmem:[%s2102_s5 + $0x8] sm:$0xff] }
 0x308   :  { %v1704_v49 = vpop.eup %1703  ;;  %1491 = vmatprep.mubr.msk.f32.mxu0 %vm474_vm2, %v559_v48  ;;  %1636 = vmatpush3.bf16.msra.mxu0 %v1633_v61 }
 0x309   :  { %v1706_v50 = vpop.eup %1705  ;;  %v560_v51 = vmul.f32 %v1704_v49, %v1688_v4  ;;  %v79_v49 = vld [vmem:[%s2102_s5 + $0x10] sm:$0xff] }
 0x30a   :  { %v561_v52 = vmul.f32 %v1706_v50, %v1690_v5  ;;  %v80_v50 = vld [vmem:[%s2102_s5 + $0x18] sm:$0xff] }
 0x30b   :  { %1492 = vmatmul.mubr.msk.f32.gmra.mrb[8].mxu0 %vm474_vm2, %v560_v51  ;;  %v1641_v51 = vpack.c.bf16 %v80_v50, %v79_v49 }
 0x30c   :  { %v1708_v53 = vpop.eup %1707  ;;  %1494 = vmatprep.mubr.msk.f32.mxu0 %vm474_vm2, %v561_v52 }
 0x30d   :  { %v562_v54 = vmul.f32 %v1708_v53, %v1692_v8 }
 0x30f   :  { %1495 = vmatmul.mubr.msk.f32.gmra.mrb[10].mxu0 %vm474_vm2, %v562_v54 }
 0x3d6   :  { %v1487_v62 = vpop.f32.mrb[4].mxu0 }
 0x3d7   :  { %v693_v63 = vmul.f32 %v1487_v62, %v1841_v32  ;;  %v653_v0 = vpop.f32.mrb[5].mxu0 }
 0x3d8   :  { %v692_v1 = vmul.f32 %v653_v0, %v1832_v27 }
 0x3da   :  { %v1613_v2 = vpack.c.bf16 %v693_v63, %v692_v1  ;;  %v1490_v3 = vpop.f32.mrb[6].mxu0  ;;  %v905_v63 = vrot.slane %v2008_v58, %v175_v16  ;;  %v67_v16 = vld [vmem:[%s2096_s4 + $0x90] sm:$0xff] }
 0x3db   :  { %v695_v4 = vmul.f32 %v1490_v3, %v1853_v36  ;;  %v663_v5 = vpop.f32.mrb[7].mxu0 }
 0x3dc   :  { %v694_v6 = vmul.f32 %v663_v5, %v1846_v33  ;;  %1614 = vmatprep.subr.bf16.mxu1 %v1613_v2  ;;  %v66_v5 = vld [vmem:[%s2096_s4 + $0x88] sm:$0xff] }
 0x3dd   :  { %1616 = vmatpush3.bf16.msra.mxu1 %v1613_v2 }
 0x3de   :  { %v1617_v7 = vpack.c.bf16 %v695_v4, %v694_v6  ;;  %v1493_v8 = vpop.f32.mrb[8].mxu0  ;;  %v1645_v6 = vpack.c.bf16 %v66_v5, %v65_v18  ;;  %v75_v18 = vld [vmem:[%s2096_s4 + $0xd0] sm:$0xff]  ;;  %v76_v5 = vld [vmem:[%s2096_s4 + $0xd8] sm:$0xff] }
 0x3df   :  { %v697_v10 = vmul.f32 %v1493_v8, %v1867_v40  ;;  %v673_v12 = vpop.f32.mrb[9].mxu0  ;;  %v48_v40 = vld [vmem:[%s2101_s3 + $0x8] sm:$0xff] }
 0x3e0   :  { %v696_v14 = vmul.f32 %v673_v12, %v1859_v37  ;;  %1618 = vmatprep.subr.bf16.mxu1 %v1617_v7  ;;  %1646 = vmatprep.subr.bf16.mxu0 %v1645_v6  ;;  %v70_v12 = vld [vmem:[%s2096_s4 + $0xa8] sm:$0xff] }
 0x3e1   :  { %1620 = vmatpush3.bf16.msra.mxu1 %v1617_v7  ;;  %v68_v7 = vld [vmem:[%s2096_s4 + $0x98] sm:$0xff] }
 0x3e2   :  { %v1621_v32 = vpack.c.bf16 %v697_v10, %v696_v14  ;;  %v1496_v27 = vpop.f32.mrb[10].mxu0  ;;  %v1649_v8 = vpack.c.bf16 %v68_v7, %v67_v16  ;;  %v69_v10 = vld [vmem:[%s2096_s4 + $0xa0] sm:$0xff] }
 0x3e3   :  { %v699_v19 = vmul.f32 %v1496_v27, %v1881_v44  ;;  %v683_v20 = vpop.f32.mrb[11].mxu0  ;;  %v784_v44 = vsub.s32 3, %v1814_v15  ;;  %v1653_v14 = vpack.c.bf16 %v70_v12, %v69_v10  ;;  %v72_v27 = vld [vmem:[%s2096_s4 + $0xb8] sm:$0xff] }
 0x3e4   :  { %v698_v36 = vmul.f32 %v683_v20, %v1873_v41  ;;  %1622 = vmatprep.subr.bf16.mxu1 %v1621_v32  ;;  %v910_v20 = vsub.s32 4, %v1814_v15 }
 0x3e5   :  { %1624 = vmatpush3.bf16.msra.mxu1 %v1621_v32  ;;  %v785_v41 = vrot.slane %v1820_v17, %v784_v44  ;;  %v71_v32 = vld [vmem:[%s2096_s4 + $0xb0] sm:$0xff] }
 0x3e6   :  { %v1625_v33 = vpack.c.bf16 %v699_v19, %v698_v36  ;;  %v1657_v19 = vpack.c.bf16 %v72_v27, %v71_v32  ;;  %v911_v36 = vrot.slane %v1820_v17, %v910_v20  ;;  %v1127_v32 = vrot.slane %v2008_v58, %v254_v11  ;;  %v81_v11 = vld [vmem:[%s2103_s6] sm:$0xff] }
 0x3e8   :  { %1626 = vmatprep.subr.bf16.mxu1 %v1625_v33 }
 0x3e9   :  { %1628 = vmatpush3.bf16.msra.mxu1 %v1625_v33 }
 0x3ec   :  { %1514 = vmatmul.mubr.msk.f32.vlgmr.msra.gmra.mrb[10].mxu1 %vm700_vm3, %v48_v40 }
 0x4bf   :  { %v1515_v37 = vpop.f32.mrb[10].mxu1 }
 0x4c0   :  { %v773_v21 = vpop.f32.mrb[11].mxu1 }
 0x4c1   :  { %1524 = vmatprep.mubr.msk.f32.mxu0 %vm91_vm0, %v773_v21 }
 0x4c2   :  { %1525 = vmatmul.mubr.msk.f32.vlgmr.msra.gmra.mrb[12].mxu0 %vm91_vm0, %v1515_v37 }
 0x4c3   :  { %1648 = vmatpush3.bf16.msra.mxu0 %v1645_v6  ;;  %v1665_v6 = vpack.c.bf16 %v76_v5, %v75_v18 }
 0x4c4   :  { %1650 = vmatprep.subr.bf16.mxu0 %v1649_v8 }
 0x4c7   :  { %1652 = vmatpush3.bf16.msra.mxu0 %v1649_v8 }
 0x4c8   :  { %1654 = vmatprep.subr.bf16.mxu0 %v1653_v14 }
 0x4cb   :  { %1656 = vmatpush3.bf16.msra.mxu0 %v1653_v14 }
 0x4cc   :  { %1658 = vmatprep.subr.bf16.mxu0 %v1657_v19 }
 0x4cf   :  { %1660 = vmatpush3.bf16.msra.mxu0 %v1657_v19 }
 0x595   :  { %v1526_v22 = vpop.f32.mrb[12].mxu0 }
 0x596   :  { %v864_v23 = vadd.f32 %v1526_v22, %v785_v41  ;;  %v858_v24 = vpop.f32.mrb[13].mxu0 }
 0x597   :  { %v859_v25 = vadd.f32 %v858_v24, %v785_v41 }
 0x598   :  { %v868_v26 = vadd.f32 %v864_v23, %v1806_v13 }
 0x599   :  { %v867_v28 = vadd.f32 %v859_v25, %v1791_v9  ;;  %v77_v9 = vld [vmem:[%s2102_s5] sm:$0xff] }
 0x59a   :  { %v872_v29 = vsel %vm91_vm0, %v868_v26, 0.0  ;;  %v1637_v48 = vpack.c.bf16 %v78_v47, %v77_v9 }
 0x59b   :  { %873 = vadd.xlane.f32.xlu1 %v872_v29  ;;  %v869_v30 = vsel %vm91_vm0, %v867_v28, 0.0 }
 0x59c   :  { %870 = vadd.xlane.f32.xlu0 %v869_v30  ;;  %1638 = vmatprep.subr.bf16.mxu1 %v1637_v48 }
 0x59d   :  { %1640 = vmatpush3.bf16.msra.mxu1 %v1637_v48 }
 0x59e   :  { %1642 = vmatprep.subr.bf16.mxu1 %v1641_v51 }
 0x5a1   :  { %1644 = vmatpush3.bf16.msra.mxu1 %v1641_v51 }
 0x628   :  { %v874_v31 = vpop.xlane.xlu1 %873 }
 0x629   :  { %v877_v34 = vmul.f32 0.03125, %v874_v31  ;;  %v871_v35 = vpop.xlane.xlu0 %870 }
 0x62a   :  { %v876_v38 = vmul.f32 0.03125, %v871_v35 }
 0x62b   :  { %v879_v39 = vsub.f32 %v868_v26, %v877_v34 }
 0x62c   :  { %v878_v42 = vsub.f32 %v867_v28, %v876_v38 }
 0x62d   :  { %v881_v43 = vmul.f32 %v879_v39, %v879_v39 }
 0x62e   :  { %v880_v45 = vmul.f32 %v878_v42, %v878_v42 }
 0x62f   :  { %v885_v46 = vsel %vm91_vm0, %v881_v43, 0.0 }
 0x630   :  { %886 = vadd.xlane.f32.xlu1 %v885_v46  ;;  %v882_v13 = vsel %vm91_vm0, %v880_v45, 0.0 }
 0x631   :  { %883 = vadd.xlane.f32.xlu0 %v882_v13  ;;  %v1013_v13 = vsub.s32 5, %v1814_v15 }
 0x633   :  { %v1014_v9 = vrot.slane %v1820_v17, %v1013_v13 }
 0x6bd   :  { %v887_v52 = vpop.xlane.xlu1 %886 }
 0x6be   :  { %v889_v53 = vmul.f32 0.03125, %v887_v52  ;;  %v884_v54 = vpop.xlane.xlu0 %883 }
 0x6bf   :  { %v888_v55 = vmul.f32 0.03125, %v884_v54 }
 0x6c0   :  { %v891_v56 = vadd.f32 1e-12, %v889_v53 }
 0x6c1   :  { %v890_v57 = vadd.f32 1e-12, %v888_v55 }
 0x6c2   :  { %1709 = vrsqrt.f32 %v891_v56 }
 0x6c3   :  { %1711 = vrsqrt.f32 %v890_v57 }
 0x6cc   :  { %v1710_v60 = vpop.eup %1709 }
 0x6cd   :  { %v1712_v61 = vpop.eup %1711  ;;  %v895_v62 = vmul.f32 %v1710_v60, %v879_v39 }
 0x6ce   :  { %v894_v0 = vmul.f32 %v1712_v61, %v878_v42 }
 0x6cf   :  { %v901_v1 = vmul.f32 %v899_v59, %v895_v62 }
 0x6d0   :  { %v900_v2 = vmul.f32 %v899_v59, %v894_v0 }
 0x6d1   :  { %v907_v4 = vadd.f32 %v905_v63, %v901_v1 }
 0x6d2   :  { %v906_v3 = vadd.f32 %v905_v63, %v900_v2  ;;  %v73_v2 = vld [vmem:[%s2096_s4 + $0xc0] sm:$0xff] }
 0x6d4   :  { %1535 = vmatprep.mubr.msk.f32.mxu1 %vm91_vm0, %v906_v3 }
 0x6d5   :  { %1536 = vmatmul.mubr.msk.f32.vlgmr.msra.gmra.mrb[12].mxu1 %vm91_vm0, %v907_v4 }
 0x7a8   :  { %v1537_v33 = vpop.f32.mrb[12].mxu1 }
 0x7a9   :  { %v990_v40 = vadd.f32 %v1537_v33, %v911_v36  ;;  %v984_v37 = vpop.f32.mrb[13].mxu1 }
 0x7aa   :  { %v985_v21 = vadd.f32 %v984_v37, %v911_v36  ;;  %v1133_v36 = vrot.slane %v2008_v58, %v784_v44  ;;  %v83_v44 = vld [vmem:[%s2103_s6 + $0x10] sm:$0xff] }
 0x7ab   :  { %v994_v41 = vmul.f32 %v990_v40, %v990_v40 }
 0x7ac   :  { %v993_v22 = vmul.f32 %v985_v21, %v985_v21 }
 0x7ad   :  { %v996_v23 = vmul.f32 %v994_v41, %v990_v40 }
 0x7ae   :  { %v995_v24 = vmul.f32 %v993_v22, %v985_v21  ;;  %v82_v22 = vld [vmem:[%s2103_s6 + $0x8] sm:$0xff] }
 0x7af   :  { %v998_v25 = vmul.f32 0.044715, %v996_v23  ;;  %v1669_v58 = vpack.c.bf16 %v82_v22, %v81_v11  ;;  %v84_v23 = vld [vmem:[%s2103_s6 + $0x18] sm:$0xff] }
 0x7b0   :  { %v997_v26 = vmul.f32 0.044715, %v995_v24  ;;  %v1673_v24 = vpack.c.bf16 %v84_v23, %v83_v44 }
 0x7b1   :  { %v1000_v28 = vadd.f32 %v998_v25, %v990_v40  ;;  %v1138_v25 = vsub.s32 6, %v1814_v15 }
 0x7b2   :  { %v999_v29 = vadd.f32 %v997_v26, %v985_v21 }
 0x7b3   :  { %v1002_v30 = vmul.f32 0.7978846, %v1000_v28  ;;  %v1139_v26 = vrot.slane %v1820_v17, %v1138_v25 }
 0x7b4   :  { %v1001_v31 = vmul.f32 0.7978846, %v999_v29 }
 0x7b5   :  { %1713 = vtanh.f32 %v1002_v30 }
 0x7b6   :  { %1715 = vtanh.f32 %v1001_v31 }
 0x7bf   :  { %v1714_v34 = vpop.eup %1713 }
 0x7c0   :  { %v1716_v35 = vpop.eup %1715  ;;  %v1006_v38 = vadd.f32 1.0, %v1714_v34 }
 0x7c1   :  { %v1005_v39 = vadd.f32 1.0, %v1716_v35 }
 0x7c2   :  { %v1008_v42 = vmul.f32 0.5, %v1006_v38  ;;  %v1225_v38 = vsub.s32 7, %v1814_v15 }
 0x7c3   :  { %v1007_v43 = vmul.f32 0.5, %v1005_v39 }
 0x7c4   :  { %v1010_v46 = vmul.f32 %v1008_v42, %v990_v40  ;;  %v1226_v39 = vrot.slane %v1820_v17, %v1225_v38 }
 0x7c5   :  { %v1009_v45 = vmul.f32 %v1007_v43, %v985_v21 }
 0x7c7   :  { %1554 = vmatprep.mubr.msk.f32.mxu0 %vm700_vm3, %v1009_v45 }
 0x7c8   :  { %1555 = vmatmul.mubr.msk.f32.vlgmr.msra.gmra.mrb[14].mxu0 %vm700_vm3, %v1010_v46 }
 0x89b   :  { %v1556_v47 = vpop.f32.mrb[14].mxu0 }
 0x89c   :  { %v1093_v48 = vadd.f32 %v1556_v47, %v1014_v9  ;;  %v1087_v49 = vpop.f32.mrb[15].mxu0 }
 0x89d   :  { %v1088_v50 = vadd.f32 %v1087_v49, %v1014_v9 }
 0x89e   :  { %v1097_v51 = vadd.f32 %v1093_v48, %v907_v4 }
 0x89f   :  { %v1096_v52 = vadd.f32 %v1088_v50, %v906_v3  ;;  %v74_v3 = vld [vmem:[%s2096_s4 + $0xc8] sm:$0xff] }
 0x8a0   :  { %v1101_v53 = vsel %vm91_vm0, %v1097_v51, 0.0  ;;  %v1661_v4 = vpack.c.bf16 %v74_v3, %v73_v2 }
 0x8a1   :  { %1102 = vadd.xlane.f32.xlu1 %v1101_v53  ;;  %v1098_v54 = vsel %vm91_vm0, %v1096_v52, 0.0 }
 0x8a2   :  { %1099 = vadd.xlane.f32.xlu0 %v1098_v54  ;;  %1662 = vmatprep.subr.bf16.mxu1 %v1661_v4 }
 0x8a3   :  { %1664 = vmatpush3.bf16.msra.mxu1 %v1661_v4 }
 0x8a4   :  { %1666 = vmatprep.subr.bf16.mxu1 %v1665_v6 }
 0x8a7   :  { %1668 = vmatpush3.bf16.msra.mxu1 %v1665_v6 }
 0x8a8   :  { %1670 = vmatprep.subr.bf16.mxu1 %v1669_v58 }
 0x92e   :  { %v1103_v55 = vpop.xlane.xlu1 %1102 }
 0x92f   :  { %v1105_v56 = vmul.f32 0.03125, %v1103_v55  ;;  %v1100_v57 = vpop.xlane.xlu0 %1099 }
 0x930   :  { %v1104_v59 = vmul.f32 0.03125, %v1100_v57 }
 0x931   :  { %v1107_v60 = vsub.f32 %v1097_v51, %v1105_v56 }
 0x932   :  { %v1106_v61 = vsub.f32 %v1096_v52, %v1104_v59 }
 0x933   :  { %v1109_v62 = vmul.f32 %v1107_v60, %v1107_v60 }
 0x934   :  { %v1108_v63 = vmul.f32 %v1106_v61, %v1106_v61 }
 0x935   :  { %v1113_v0 = vsel %vm91_vm0, %v1109_v62, 0.0 }
 0x936   :  { %1114 = vadd.xlane.f32.xlu1 %v1113_v0  ;;  %v1110_v1 = vsel %vm91_vm0, %v1108_v63, 0.0 }
 0x937   :  { %1111 = vadd.xlane.f32.xlu0 %v1110_v1 }
 0x9c3   :  { %v1115_v16 = vpop.xlane.xlu1 %1114 }
 0x9c4   :  { %v1117_v7 = vmul.f32 0.03125, %v1115_v16  ;;  %v1112_v8 = vpop.xlane.xlu0 %1111 }
 0x9c5   :  { %v1116_v10 = vmul.f32 0.03125, %v1112_v8 }
 0x9c6   :  { %v1119_v12 = vadd.f32 1e-12, %v1117_v7 }
 0x9c7   :  { %v1118_v14 = vadd.f32 1e-12, %v1116_v10 }
 0x9c8   :  { %1717 = vrsqrt.f32 %v1119_v12 }
 0x9c9   :  { %1719 = vrsqrt.f32 %v1118_v14 }
 0x9d2   :  { %v1718_v27 = vpop.eup %1717 }
 0x9d3   :  { %v1720_v19 = vpop.eup %1719  ;;  %v1123_v20 = vmul.f32 %v1718_v27, %v1107_v60 }
 0x9d4   :  { %v1122_v33 = vmul.f32 %v1720_v19, %v1106_v61 }
 0x9d5   :  { %v1129_v40 = vmul.f32 %v1127_v32, %v1123_v20 }
 0x9d6   :  { %v1128_v37 = vmul.f32 %v1127_v32, %v1122_v33 }
 0x9d7   :  { %v1135_v41 = vadd.f32 %v1133_v36, %v1129_v40 }
 0x9d8   :  { %v1134_v21 = vadd.f32 %v1133_v36, %v1128_v37 }
 0x9da   :  { %1565 = vmatprep.mubr.msk.f32.mxu1 %vm91_vm0, %v1134_v21 }
 0x9db   :  { %1566 = vmatmul.mubr.msk.f32.vlgmr.msra.gmra.mrb[14].mxu1 %vm91_vm0, %v1135_v41 }
 0x9dc   :  { %1672 = vmatpush3.bf16.msra.mxu1 %v1669_v58 }
 0x9dd   :  { %1674 = vmatprep.subr.bf16.mxu1 %v1673_v24 }
 0x9e0   :  { %1676 = vmatpush3.bf16.msra.mxu1 %v1673_v24 }
 0xaae   :  { %v1567_v28 = vpop.f32.mrb[14].mxu1 }
 0xaaf   :  { %v1218_v29 = vadd.f32 %v1567_v28, %v1139_v26  ;;  %v1212_v30 = vpop.f32.mrb[15].mxu1 }
 0xab0   :  { %v1213_v31 = vadd.f32 %v1212_v30, %v1139_v26 }
 0xab2   :  { %1721 = vtanh.f32 %v1213_v31 }
 0xab3   :  { %1723 = vtanh.f32 %v1218_v29 }
 0xabc   :  { %v1722_v34 = vpop.eup %1721 }
 0xabd   :  { %v1724_v35 = vpop.eup %1723  ;;  %1576 = vmatprep.mubr.msk.f32.mxu1 %vm91_vm0, %v1722_v34 }
 0xabe   :  { %1577 = vmatmul.mubr.msk.f32.vlgmr.msra.gmra.mrb[16].mxu1 %vm91_vm0, %v1724_v35 }
 0xb91   :  { %v1578_v42 = vpop.f32.mrb[16].mxu1 }
 0xb92   :  { %v1305_v43 = vadd.f32 %v1578_v42, %v1226_v39  ;;  %v1299_v45 = vpop.f32.mrb[17].mxu1 }
 0xb93   :  { %v1300_v46 = vadd.f32 %v1299_v45, %v1226_v39 }
 0xb94   :  { %1309 = vst [vmem:[%s2104_s8 + $0x8] sm:$0xff] %v1305_v43 }
 0xb95   :  { %1308 = vst [vmem:[%s2104_s8] sm:$0xff] %v1300_v46 }

</bundles_post_ra>
